<compile_context>
chip_gen: v5e
topology: v5e:2x2
jax: 0.10.0
libtpu: 0.0.40
codegen_flags: <defaults>
</compile_context>

<pallas_src>
import jax
import jax.numpy as jnp
from jax.experimental import pallas as pl
from jax.experimental.pallas import tpu as pltpu

# ------------------------- synthetic configuration -------------------------
BATCH        = 8
SCE_EMB_DIMS = (8, 8)             # 2 scenario features  -> sce_dims = 16
AGN_EMB_DIMS = (16, 16, 16)       # 3 agnostic features  -> agn_dims = 48
SCE_DIMS     = sum(SCE_EMB_DIMS)
AGN_DIMS     = sum(AGN_EMB_DIMS)
DIMS         = SCE_DIMS + AGN_DIMS
MLP_DIMS     = (64, 32)           # mlp_params["dims"]
H1, H2       = MLP_DIMS
VOCAB        = 10
EPSILON      = 0.01
BETA         = 2.0
ALPHA0       = 1.0
DELTA_ALPHA  = 1e-4
BN_EPS       = 1e-5
MAX_TILE_B   = 512                # batch rows per grid step (weights stay VMEM-resident)


# ------------------------------ Pallas kernel ------------------------------
def _gate(z, alpha):
    """AdaSparse 'Fusion' weighting factor: beta*sigmoid -> alpha-binarize -> eps-prune."""
    # TODO(synk): the repo's Pruner source was not provided; this follows the
    # AdaSparse (CIKM'22) Fusion form (scaling * alpha-binarization + eps-prune).
    pi = BETA * jax.nn.sigmoid(z)
    pi = jnp.clip(alpha * (pi - 0.5) + 0.5, 0.0, BETA)
    return jnp.where(jnp.abs(pi) >= EPSILON, pi, 0.0)


def adasparse_kernel(alpha_ref,                    # (1,)  f32 SMEM scalar
                     x_ref,                        # (TB, DIMS) = [sce | agn]
                     p0w_ref,                      # (DIMS, DIMS) augmented pruner-0
                     w1_ref,                       # (DIMS, H1)  BN-folded
                     p1w_ref,                      # (SCE_DIMS+H1, H1)
                     w2_ref,                       # (H1, H2)    BN-folded
                     p2w_ref,                      # (SCE_DIMS+H2, H2)
                     wf_ref,                       # (1, H2) final weight row
                     bias_ref,                     # (8, 128) packed bias slab
                     out_ref):                     # (TB, 1)
    alpha = alpha_ref[0]
    x0 = x_ref[...]                                # (TB, DIMS)
    sce = x0[:, :SCE_DIMS]                         # (TB, 16) offset-0 lane slice

    b_p0 = bias_ref[0:1, :DIMS]                    # dummy sce cols are zero
    b_1  = bias_ref[1:2, :H1]
    b_p1 = bias_ref[2:3, :H1]
    b_2  = bias_ref[3:4, :H2]
    b_p2 = bias_ref[4:5, :H2]
    b_f  = bias_ref[5:6, 0:1]

    # Pruner 0, fused over the full [sce|agn] width with one K=DIMS matmul.
    # The first SCE_DIMS output columns are dummies and are masked back to 1.0,
    # so x1 == concat(sce, pruner0(sce, agn, alpha) * agn) without a lane concat.
    z0 = jnp.dot(x0, p0w_ref[...], preferred_element_type=jnp.float32) + b_p0
    g0 = _gate(z0, alpha)
    col = jax.lax.broadcasted_iota(jnp.int32, z0.shape, 1)
    m0 = jnp.where(col < SCE_DIMS, 1.0, g0)
    x1 = x0 * m0

    # Layer 1: Linear (+ folded BatchNorm) -> ReLU -> Dropout(eval)=id -> Pruner 1.
    h = jnp.dot(x1, w1_ref[...], preferred_element_type=jnp.float32) + b_1
    h = jnp.maximum(h, 0.0)
    z1 = (jnp.dot(sce, p1w_ref[:SCE_DIMS, :], preferred_element_type=jnp.float32)
          + jnp.dot(h, p1w_ref[SCE_DIMS:, :], preferred_element_type=jnp.float32)
          + b_p1)
    h = _gate(z1, alpha) * h

    # Layer 2: Linear (+ folded BatchNorm) -> ReLU -> Pruner 2.
    h2 = jnp.dot(h, w2_ref[...], preferred_element_type=jnp.float32) + b_2
    h2 = jnp.maximum(h2, 0.0)
    z2 = (jnp.dot(sce, p2w_ref[:SCE_DIMS, :], preferred_element_type=jnp.float32)
          + jnp.dot(h2, p2w_ref[SCE_DIMS:, :], preferred_element_type=jnp.float32)
          + b_p2)
    h2 = _gate(z2, alpha) * h2

    # Final Linear(H2 -> 1): VPU multiply + lane reduction (skip an N=1 MXU pass).
    logit = jnp.sum(h2 * wf_ref[...], axis=-1, keepdims=True) + b_f
    out_ref[...] = jax.nn.sigmoid(logit)           # (TB, 1)


# --------------------------- param preprocessing ----------------------------
def prepare_kernel_params(params):
    """Fold eval-mode BN into W/b, augment pruner-0, pack biases into one slab."""
    w1f = params["w1"] * params["bn1s"]
    b1f = params["b1"] * params["bn1s"] + params["bn1b"]
    w2f = params["w2"] * params["bn2s"]
    b2f = params["b2"] * params["bn2s"] + params["bn2b"]

    # Pruner-0 weight augmented to full output width DIMS; the first SCE_DIMS output
    # columns are zero dummies that the kernel masks back to 1.0.
    p0w_aug = jnp.zeros((DIMS, DIMS), jnp.float32).at[:, SCE_DIMS:].set(params["p0w"])

    # One lane-dense (8, 128) bias slab -> single DMA per kernel call.
    slab = jnp.zeros((8, 128), jnp.float32)
    slab = slab.at[0, SCE_DIMS:DIMS].set(params["p0b"][0])
    slab = slab.at[1, :H1].set(b1f[0])
    slab = slab.at[2, :H1].set(params["p1b"][0])
    slab = slab.at[3, :H2].set(b2f[0])
    slab = slab.at[4, :H2].set(params["p2b"][0])
    slab = slab.at[5, 0].set(params["bf"][0, 0])

    return {
        "sce_emb": params["sce_emb"], "agn_emb": params["agn_emb"],
        "p0w": p0w_aug, "w1": w1f, "p1w": params["p1w"],
        "w2": w2f, "p2w": params["p2w"],
        "wf_row": params["wf"].T,          # (1, H2)
        "bias": slab,
    }


# ------------------------------ JAX wrapper ---------------------------------
def adasparse_forward(kparams, sce_idx, agn_idx, alpha):
    # "with torch.no_grad(): self.alpha += self.delta_alpha"  (one forward step)
    alpha = jnp.asarray(alpha, jnp.float32) + DELTA_ALPHA

    # Embedding lookups + concat (squeeze_dim=True) stay in plain JAX glue.
    cols = ([tbl[sce_idx[:, i]] for i, tbl in enumerate(kparams["sce_emb"])]
            + [tbl[agn_idx[:, i]] for i, tbl in enumerate(kparams["agn_emb"])])
    x_cat = jnp.concatenate(cols, axis=1)           # (B, DIMS) = [sce | agn]

    B = x_cat.shape[0]
    tile_b = B if B < MAX_TILE_B else MAX_TILE_B
    grid = (pl.cdiv(B, tile_b),)
    alpha_arr = jnp.reshape(alpha, (1,)).astype(jnp.float32)

    full = lambda a: pl.BlockSpec(a.shape, lambda i: (0, 0))   # VMEM-resident weights

    out = pl.pallas_call(
        adasparse_kernel,
        out_shape=jax.ShapeDtypeStruct((B, 1), jnp.float32),
        grid=grid,
        in_specs=[
            pl.BlockSpec(memory_space=pltpu.MemorySpace.SMEM),    # alpha scalar
            pl.BlockSpec((tile_b, DIMS), lambda i: (i, 0)),       # activations
            full(kparams["p0w"]), full(kparams["w1"]), full(kparams["p1w"]),
            full(kparams["w2"]), full(kparams["p2w"]),
            full(kparams["wf_row"]), full(kparams["bias"]),
        ],
        out_specs=pl.BlockSpec((tile_b, 1), lambda i: (i, 0)),
        compiler_params=pltpu.CompilerParams(
            dimension_semantics=("parallel",)),
    )(alpha_arr, x_cat,
      kparams["p0w"], kparams["w1"], kparams["p1w"],
      kparams["w2"], kparams["p2w"], kparams["wf_row"], kparams["bias"])

    return out[:, 0], alpha                          # .squeeze() -> (B,)


adasparse_forward_jit = jax.jit(adasparse_forward)


# --------------------------- pure-JAX reference -----------------------------
def adasparse_reference(params, sce_idx, agn_idx, alpha):
    alpha = alpha + DELTA_ALPHA
    sce_x = jnp.concatenate(
        [tbl[sce_idx[:, i]] for i, tbl in enumerate(params["sce_emb"])], axis=1)
    agn_x = jnp.concatenate(
        [tbl[agn_idx[:, i]] for i, tbl in enumerate(params["agn_emb"])], axis=1)

    def pruner(w, b, x):
        z = jnp.concatenate([sce_x, x], axis=1) @ w + b
        pi = BETA * jax.nn.sigmoid(z)
        pi = jnp.clip(alpha * (pi - 0.5) + 0.5, 0.0, BETA)
        return jnp.where(jnp.abs(pi) >= EPSILON, pi, 0.0)

    agn = pruner(params["p0w"], params["p0b"], agn_x) * agn_x
    x = jnp.concatenate([sce_x, agn], axis=1)
    h = jnp.maximum((x @ params["w1"] + params["b1"]) * params["bn1s"] + params["bn1b"], 0.0)
    h = pruner(params["p1w"], params["p1b"], h) * h
    h2 = jnp.maximum((h @ params["w2"] + params["b2"]) * params["bn2s"] + params["bn2b"], 0.0)
    h2 = pruner(params["p2w"], params["p2b"], h2) * h2
    logit = h2 @ params["wf"] + params["bf"]
    return jax.nn.sigmoid(logit)[:, 0]


# ------------------------------ param init ----------------------------------
def init_params(key):
    ks = iter(jax.random.split(key, 32))

    def lin(in_d, out_d):
        bound = 1.0 / jnp.sqrt(in_d)
        w = jax.random.uniform(next(ks), (in_d, out_d), jnp.float32, -bound, bound)
        b = jax.random.uniform(next(ks), (1, out_d), jnp.float32, -bound, bound)
        return w, b

    params = {}
    params["sce_emb"] = [jax.random.normal(next(ks), (VOCAB, d), jnp.float32) * 0.1
                         for d in SCE_EMB_DIMS]
    params["agn_emb"] = [jax.random.normal(next(ks), (VOCAB, d), jnp.float32) * 0.1
                         for d in AGN_EMB_DIMS]

    # pruner 0: Linear(sce_dims + agn_dims, agn_dims)
    params["p0w"], params["p0b"] = lin(SCE_DIMS + AGN_DIMS, AGN_DIMS)

    params["w1"], params["b1"] = lin(DIMS, H1)
    params["w2"], params["b2"] = lin(H1, H2)
    params["wf"], params["bf"] = lin(H2, 1)

    # BatchNorm1d (eval): gamma=1, beta=0, running_mean=0, running_var=1 ->
    # per-feature scale/shift (folded into W/b for the kernel path).
    bn_scale = 1.0 / jnp.sqrt(1.0 + BN_EPS)
    params["bn1s"] = jnp.full((1, H1), bn_scale, jnp.float32)
    params["bn1b"] = jnp.zeros((1, H1), jnp.float32)
    params["bn2s"] = jnp.full((1, H2), bn_scale, jnp.float32)
    params["bn2b"] = jnp.zeros((1, H2), jnp.float32)

    # pruner 1: Linear(sce_dims + H1, H1); pruner 2: Linear(sce_dims + H2, H2)
    params["p1w"], params["p1b"] = lin(SCE_DIMS + H1, H1)
    params["p2w"], params["p2b"] = lin(SCE_DIMS + H2, H2)
    return params


# ---------------------------------- main ------------------------------------
if __name__ == "__main__":
    key = jax.random.PRNGKey(0)
    k_params, k_sce, k_agn = jax.random.split(key, 3)

    params = init_params(k_params)
    kparams = prepare_kernel_params(params)
    sce_idx = jax.random.randint(k_sce, (BATCH, len(SCE_EMB_DIMS)), 0, VOCAB)
    agn_idx = jax.random.randint(k_agn, (BATCH, len(AGN_EMB_DIMS)), 0, VOCAB)

    out, new_alpha = adasparse_forward_jit(kparams, sce_idx, agn_idx, ALPHA0)
    out = jax.block_until_ready(out)

    ref = adasparse_reference(params, sce_idx, agn_idx, ALPHA0)
    assert out.shape == (BATCH,)
    assert jnp.allclose(out, ref, atol=5e-3), (out, ref)

    print("KERNEL_OK")
</pallas_src>

<mosaic_0001>
module attributes {stable_mosaic.version = 11 : i64} {
  func.func @adasparse_kernel(%arg0: i32, %arg1: memref<1xf32, #tpu.memory_space<smem>>, %arg2: memref<8x64xf32, #tpu.memory_space<vmem>>, %arg3: memref<64x64xf32, #tpu.memory_space<vmem>>, %arg4: memref<64x64xf32, #tpu.memory_space<vmem>>, %arg5: memref<80x64xf32, #tpu.memory_space<vmem>>, %arg6: memref<64x32xf32, #tpu.memory_space<vmem>>, %arg7: memref<48x32xf32, #tpu.memory_space<vmem>>, %arg8: memref<1x32xf32, #tpu.memory_space<vmem>>, %arg9: memref<8x128xf32, #tpu.memory_space<vmem>>, %arg10: memref<8x1xf32, #tpu.memory_space<vmem>>) attributes {dimension_semantics = [#tpu.dimension_semantics<parallel>], iteration_bounds = array<i64: 1>, scalar_prefetch = 0 : i64, scratch_operands = 0 : i64, tpu.core_type = #tpu.core_type<tc>, window_params = [{transform_indices = @transform_0, window_bounds = array<i64: 1>}, {transform_indices = @transform_1, window_bounds = array<i64: 8, 64>}, {pipeline_mode = #tpu.pipeline_mode<synchronous>, transform_indices = @transform_2, window_bounds = array<i64: 64, 64>}, {pipeline_mode = #tpu.pipeline_mode<synchronous>, transform_indices = @transform_3, window_bounds = array<i64: 64, 64>}, {pipeline_mode = #tpu.pipeline_mode<synchronous>, transform_indices = @transform_4, window_bounds = array<i64: 80, 64>}, {pipeline_mode = #tpu.pipeline_mode<synchronous>, transform_indices = @transform_5, window_bounds = array<i64: 64, 32>}, {pipeline_mode = #tpu.pipeline_mode<synchronous>, transform_indices = @transform_6, window_bounds = array<i64: 48, 32>}, {pipeline_mode = #tpu.pipeline_mode<synchronous>, transform_indices = @transform_7, window_bounds = array<i64: 1, 32>}, {pipeline_mode = #tpu.pipeline_mode<synchronous>, transform_indices = @transform_8, window_bounds = array<i64: 8, 128>}, {transform_indices = @transform_9, window_bounds = array<i64: 8, 1>}]} {
    %c0 = arith.constant 0 : index
    %0 = memref.load %arg1[%c0] : memref<1xf32, #tpu.memory_space<smem>>
    %c0_0 = arith.constant 0 : index
    %c0_1 = arith.constant 0 : index
    %1 = vector.load %arg2[%c0_0, %c0_1] : memref<8x64xf32, #tpu.memory_space<vmem>>, vector<8x64xf32>
    %2 = vector.extract_strided_slice %1 {offsets = [0, 0], sizes = [8, 16], strides = [1, 1]} : vector<8x64xf32> to vector<8x16xf32>
    %c0_2 = arith.constant 0 : index
    %c0_3 = arith.constant 0 : index
    %3 = vector.load %arg9[%c0_2, %c0_3] : memref<8x128xf32, #tpu.memory_space<vmem>>, vector<1x64xf32>
    %c1 = arith.constant 1 : index
    %c0_4 = arith.constant 0 : index
    %4 = vector.load %arg9[%c1, %c0_4] : memref<8x128xf32, #tpu.memory_space<vmem>>, vector<1x64xf32>
    %c2 = arith.constant 2 : index
    %c0_5 = arith.constant 0 : index
    %5 = vector.load %arg9[%c2, %c0_5] : memref<8x128xf32, #tpu.memory_space<vmem>>, vector<1x64xf32>
    %c3 = arith.constant 3 : index
    %c0_6 = arith.constant 0 : index
    %6 = vector.load %arg9[%c3, %c0_6] : memref<8x128xf32, #tpu.memory_space<vmem>>, vector<1x32xf32>
    %c4 = arith.constant 4 : index
    %c0_7 = arith.constant 0 : index
    %7 = vector.load %arg9[%c4, %c0_7] : memref<8x128xf32, #tpu.memory_space<vmem>>, vector<1x32xf32>
    %c5 = arith.constant 5 : index
    %c0_8 = arith.constant 0 : index
    %8 = vector.load %arg9[%c5, %c0_8] : memref<8x128xf32, #tpu.memory_space<vmem>>, vector<1x1xf32>
    %c0_9 = arith.constant 0 : index
    %c0_10 = arith.constant 0 : index
    %9 = vector.load %arg3[%c0_9, %c0_10] : memref<64x64xf32, #tpu.memory_space<vmem>>, vector<64x64xf32>
    %cst = arith.constant dense<0.000000e+00> : vector<8x64xf32>
    %10 = tpu.matmul %1, %9, %cst {dimension_numbers = #tpu.dot_dimension_numbers<[1], [0], [0], [1], [0, 0, 1, 1], [], []>} : vector<8x64xf32>, vector<64x64xf32>, vector<8x64xf32> -> vector<8x64xf32>
    %11 = vector.broadcast %3 : vector<1x64xf32> to vector<8x64xf32>
    %12 = arith.addf %10, %11 : vector<8x64xf32>
    %13 = arith.negf %12 : vector<8x64xf32>
    %14 = math.exp %13 : vector<8x64xf32>
    %cst_11 = arith.constant 1.000000e+00 : f32
    %15 = vector.broadcast %cst_11 : f32 to vector<8x64xf32>
    %16 = arith.addf %15, %14 : vector<8x64xf32>
    %17 = arith.divf %15, %16 : vector<8x64xf32>
    %cst_12 = arith.constant 2.000000e+00 : f32
    %18 = vector.broadcast %cst_12 : f32 to vector<8x64xf32>
    %19 = arith.mulf %18, %17 : vector<8x64xf32>
    %cst_13 = arith.constant 5.000000e-01 : f32
    %20 = vector.broadcast %cst_13 : f32 to vector<8x64xf32>
    %21 = arith.subf %19, %20 : vector<8x64xf32>
    %22 = vector.broadcast %0 : f32 to vector<8x64xf32>
    %23 = arith.mulf %22, %21 : vector<8x64xf32>
    %cst_14 = arith.constant 5.000000e-01 : f32
    %24 = vector.broadcast %cst_14 : f32 to vector<8x64xf32>
    %25 = arith.addf %23, %24 : vector<8x64xf32>
    %cst_15 = arith.constant 0.000000e+00 : f32
    %cst_16 = arith.constant 2.000000e+00 : f32
    %26 = vector.broadcast %cst_15 : f32 to vector<8x64xf32>
    %27 = arith.maximumf %26, %25 : vector<8x64xf32>
    %28 = vector.broadcast %cst_16 : f32 to vector<8x64xf32>
    %29 = arith.minimumf %28, %27 : vector<8x64xf32>
    %30 = math.absf %29 : vector<8x64xf32>
    %cst_17 = arith.constant 0.00999999977 : f32
    %31 = vector.broadcast %cst_17 : f32 to vector<8x64xf32>
    %32 = arith.cmpf oge, %30, %31 : vector<8x64xf32>
    %cst_18 = arith.constant 0.000000e+00 : f32
    %33 = vector.broadcast %cst_18 : f32 to vector<8x64xf32>
    %34 = arith.select %32, %29, %33 : vector<8x64xi1>, vector<8x64xf32>
    %35 = tpu.iota {dimensions = array<i32: 1>} : vector<8x64xi32>
    %c16_i32 = arith.constant 16 : i32
    %36 = vector.broadcast %c16_i32 : i32 to vector<8x64xi32>
    %37 = arith.cmpi slt, %35, %36 : vector<8x64xi32>
    %cst_19 = arith.constant 1.000000e+00 : f32
    %38 = vector.broadcast %cst_19 : f32 to vector<8x64xf32>
    %39 = arith.select %37, %38, %34 : vector<8x64xi1>, vector<8x64xf32>
    %40 = arith.mulf %1, %39 : vector<8x64xf32>
    %c0_20 = arith.constant 0 : index
    %c0_21 = arith.constant 0 : index
    %41 = vector.load %arg4[%c0_20, %c0_21] : memref<64x64xf32, #tpu.memory_space<vmem>>, vector<64x64xf32>
    %cst_22 = arith.constant dense<0.000000e+00> : vector<8x64xf32>
    %42 = tpu.matmul %40, %41, %cst_22 {dimension_numbers = #tpu.dot_dimension_numbers<[1], [0], [0], [1], [0, 0, 1, 1], [], []>} : vector<8x64xf32>, vector<64x64xf32>, vector<8x64xf32> -> vector<8x64xf32>
    %43 = vector.broadcast %4 : vector<1x64xf32> to vector<8x64xf32>
    %44 = arith.addf %42, %43 : vector<8x64xf32>
    %cst_23 = arith.constant 0.000000e+00 : f32
    %45 = vector.broadcast %cst_23 : f32 to vector<8x64xf32>
    %46 = arith.maximumf %44, %45 : vector<8x64xf32>
    %c0_24 = arith.constant 0 : index
    %c0_25 = arith.constant 0 : index
    %47 = vector.load %arg5[%c0_24, %c0_25] : memref<80x64xf32, #tpu.memory_space<vmem>>, vector<16x64xf32>
    %cst_26 = arith.constant dense<0.000000e+00> : vector<8x64xf32>
    %48 = tpu.matmul %2, %47, %cst_26 {dimension_numbers = #tpu.dot_dimension_numbers<[1], [0], [0], [1], [0, 0, 1, 1], [], []>} : vector<8x16xf32>, vector<16x64xf32>, vector<8x64xf32> -> vector<8x64xf32>
    %c16 = arith.constant 16 : index
    %c0_27 = arith.constant 0 : index
    %49 = vector.load %arg5[%c16, %c0_27] : memref<80x64xf32, #tpu.memory_space<vmem>>, vector<64x64xf32>
    %cst_28 = arith.constant dense<0.000000e+00> : vector<8x64xf32>
    %50 = tpu.matmul %46, %49, %cst_28 {dimension_numbers = #tpu.dot_dimension_numbers<[1], [0], [0], [1], [0, 0, 1, 1], [], []>} : vector<8x64xf32>, vector<64x64xf32>, vector<8x64xf32> -> vector<8x64xf32>
    %51 = arith.addf %48, %50 : vector<8x64xf32>
    %52 = vector.broadcast %5 : vector<1x64xf32> to vector<8x64xf32>
    %53 = arith.addf %51, %52 : vector<8x64xf32>
    %54 = arith.negf %53 : vector<8x64xf32>
    %55 = math.exp %54 : vector<8x64xf32>
    %cst_29 = arith.constant 1.000000e+00 : f32
    %56 = vector.broadcast %cst_29 : f32 to vector<8x64xf32>
    %57 = arith.addf %56, %55 : vector<8x64xf32>
    %58 = arith.divf %56, %57 : vector<8x64xf32>
    %cst_30 = arith.constant 2.000000e+00 : f32
    %59 = vector.broadcast %cst_30 : f32 to vector<8x64xf32>
    %60 = arith.mulf %59, %58 : vector<8x64xf32>
    %cst_31 = arith.constant 5.000000e-01 : f32
    %61 = vector.broadcast %cst_31 : f32 to vector<8x64xf32>
    %62 = arith.subf %60, %61 : vector<8x64xf32>
    %63 = vector.broadcast %0 : f32 to vector<8x64xf32>
    %64 = arith.mulf %63, %62 : vector<8x64xf32>
    %cst_32 = arith.constant 5.000000e-01 : f32
    %65 = vector.broadcast %cst_32 : f32 to vector<8x64xf32>
    %66 = arith.addf %64, %65 : vector<8x64xf32>
    %cst_33 = arith.constant 0.000000e+00 : f32
    %cst_34 = arith.constant 2.000000e+00 : f32
    %67 = vector.broadcast %cst_33 : f32 to vector<8x64xf32>
    %68 = arith.maximumf %67, %66 : vector<8x64xf32>
    %69 = vector.broadcast %cst_34 : f32 to vector<8x64xf32>
    %70 = arith.minimumf %69, %68 : vector<8x64xf32>
    %71 = math.absf %70 : vector<8x64xf32>
    %cst_35 = arith.constant 0.00999999977 : f32
    %72 = vector.broadcast %cst_35 : f32 to vector<8x64xf32>
    %73 = arith.cmpf oge, %71, %72 : vector<8x64xf32>
    %cst_36 = arith.constant 0.000000e+00 : f32
    %74 = vector.broadcast %cst_36 : f32 to vector<8x64xf32>
    %75 = arith.select %73, %70, %74 : vector<8x64xi1>, vector<8x64xf32>
    %76 = arith.mulf %75, %46 : vector<8x64xf32>
    %c0_37 = arith.constant 0 : index
    %c0_38 = arith.constant 0 : index
    %77 = vector.load %arg6[%c0_37, %c0_38] : memref<64x32xf32, #tpu.memory_space<vmem>>, vector<64x32xf32>
    %cst_39 = arith.constant dense<0.000000e+00> : vector<8x32xf32>
    %78 = tpu.matmul %76, %77, %cst_39 {dimension_numbers = #tpu.dot_dimension_numbers<[1], [0], [0], [1], [0, 0, 1, 1], [], []>} : vector<8x64xf32>, vector<64x32xf32>, vector<8x32xf32> -> vector<8x32xf32>
    %79 = vector.broadcast %6 : vector<1x32xf32> to vector<8x32xf32>
    %80 = arith.addf %78, %79 : vector<8x32xf32>
    %cst_40 = arith.constant 0.000000e+00 : f32
    %81 = vector.broadcast %cst_40 : f32 to vector<8x32xf32>
    %82 = arith.maximumf %80, %81 : vector<8x32xf32>
    %c0_41 = arith.constant 0 : index
    %c0_42 = arith.constant 0 : index
    %83 = vector.load %arg7[%c0_41, %c0_42] : memref<48x32xf32, #tpu.memory_space<vmem>>, vector<16x32xf32>
    %cst_43 = arith.constant dense<0.000000e+00> : vector<8x32xf32>
    %84 = tpu.matmul %2, %83, %cst_43 {dimension_numbers = #tpu.dot_dimension_numbers<[1], [0], [0], [1], [0, 0, 1, 1], [], []>} : vector<8x16xf32>, vector<16x32xf32>, vector<8x32xf32> -> vector<8x32xf32>
    %c16_44 = arith.constant 16 : index
    %c0_45 = arith.constant 0 : index
    %85 = vector.load %arg7[%c16_44, %c0_45] : memref<48x32xf32, #tpu.memory_space<vmem>>, vector<32x32xf32>
    %cst_46 = arith.constant dense<0.000000e+00> : vector<8x32xf32>
    %86 = tpu.matmul %82, %85, %cst_46 {dimension_numbers = #tpu.dot_dimension_numbers<[1], [0], [0], [1], [0, 0, 1, 1], [], []>} : vector<8x32xf32>, vector<32x32xf32>, vector<8x32xf32> -> vector<8x32xf32>
    %87 = arith.addf %84, %86 : vector<8x32xf32>
    %88 = vector.broadcast %7 : vector<1x32xf32> to vector<8x32xf32>
    %89 = arith.addf %87, %88 : vector<8x32xf32>
    %90 = arith.negf %89 : vector<8x32xf32>
    %91 = math.exp %90 : vector<8x32xf32>
    %cst_47 = arith.constant 1.000000e+00 : f32
    %92 = vector.broadcast %cst_47 : f32 to vector<8x32xf32>
    %93 = arith.addf %92, %91 : vector<8x32xf32>
    %94 = arith.divf %92, %93 : vector<8x32xf32>
    %cst_48 = arith.constant 2.000000e+00 : f32
    %95 = vector.broadcast %cst_48 : f32 to vector<8x32xf32>
    %96 = arith.mulf %95, %94 : vector<8x32xf32>
    %cst_49 = arith.constant 5.000000e-01 : f32
    %97 = vector.broadcast %cst_49 : f32 to vector<8x32xf32>
    %98 = arith.subf %96, %97 : vector<8x32xf32>
    %99 = vector.broadcast %0 : f32 to vector<8x32xf32>
    %100 = arith.mulf %99, %98 : vector<8x32xf32>
    %cst_50 = arith.constant 5.000000e-01 : f32
    %101 = vector.broadcast %cst_50 : f32 to vector<8x32xf32>
    %102 = arith.addf %100, %101 : vector<8x32xf32>
    %cst_51 = arith.constant 0.000000e+00 : f32
    %cst_52 = arith.constant 2.000000e+00 : f32
    %103 = vector.broadcast %cst_51 : f32 to vector<8x32xf32>
    %104 = arith.maximumf %103, %102 : vector<8x32xf32>
    %105 = vector.broadcast %cst_52 : f32 to vector<8x32xf32>
    %106 = arith.minimumf %105, %104 : vector<8x32xf32>
    %107 = math.absf %106 : vector<8x32xf32>
    %cst_53 = arith.constant 0.00999999977 : f32
    %108 = vector.broadcast %cst_53 : f32 to vector<8x32xf32>
    %109 = arith.cmpf oge, %107, %108 : vector<8x32xf32>
    %cst_54 = arith.constant 0.000000e+00 : f32
    %110 = vector.broadcast %cst_54 : f32 to vector<8x32xf32>
    %111 = arith.select %109, %106, %110 : vector<8x32xi1>, vector<8x32xf32>
    %112 = arith.mulf %111, %82 : vector<8x32xf32>
    %c0_55 = arith.constant 0 : index
    %c0_56 = arith.constant 0 : index
    %113 = vector.load %arg8[%c0_55, %c0_56] : memref<1x32xf32, #tpu.memory_space<vmem>>, vector<1x32xf32>
    %114 = vector.broadcast %113 : vector<1x32xf32> to vector<8x32xf32>
    %115 = arith.mulf %112, %114 : vector<8x32xf32>
    %cst_57 = arith.constant dense<0.000000e+00> : vector<8xf32>
    %116 = vector.multi_reduction <add>, %115, %cst_57 [1] : vector<8x32xf32> to vector<8xf32>
    %117 = vector.shape_cast %116 : vector<8xf32> to vector<8x1xf32>
    %118 = vector.broadcast %8 : vector<1x1xf32> to vector<8x1xf32>
    %119 = arith.addf %117, %118 : vector<8x1xf32>
    %120 = arith.negf %119 : vector<8x1xf32>
    %121 = math.exp %120 : vector<8x1xf32>
    %cst_58 = arith.constant 1.000000e+00 : f32
    %122 = vector.broadcast %cst_58 : f32 to vector<8x1xf32>
    %123 = arith.addf %122, %121 : vector<8x1xf32>
    %124 = arith.divf %122, %123 : vector<8x1xf32>
    %c0_59 = arith.constant 0 : index
    %c0_60 = arith.constant 0 : index
    %125 = vector.load %arg10[%c0_59, %c0_60] : memref<8x1xf32, #tpu.memory_space<vmem>>, vector<8x1xf32>
    tpu.vector_store %arg10[%c0_59, %c0_60], %124 {strides = array<i32>} : memref<8x1xf32, #tpu.memory_space<vmem>>, vector<8x1xf32>,
    return
  }
  func.func @transform_0(%arg0: i32) -> i32 {
    %c0_i32 = arith.constant 0 : i32
    %c0_i32_0 = arith.constant 0 : i32
    return %c0_i32 : i32
  }
  func.func @transform_1(%arg0: i32) -> (i32, i32) {
    %c0_i32 = arith.constant 0 : i32
    %c0_i32_0 = arith.constant 0 : i32
    return %arg0, %c0_i32 : i32, i32
  }
  func.func @transform_2(%arg0: i32) -> (i32, i32) {
    %c0_i32 = arith.constant 0 : i32
    %c0_i32_0 = arith.constant 0 : i32
    %c0_i32_1 = arith.constant 0 : i32
    return %c0_i32, %c0_i32_0 : i32, i32
  }
  func.func @transform_3(%arg0: i32) -> (i32, i32) {
    %c0_i32 = arith.constant 0 : i32
    %c0_i32_0 = arith.constant 0 : i32
    %c0_i32_1 = arith.constant 0 : i32
    return %c0_i32, %c0_i32_0 : i32, i32
  }
  func.func @transform_4(%arg0: i32) -> (i32, i32) {
    %c0_i32 = arith.constant 0 : i32
    %c0_i32_0 = arith.constant 0 : i32
    %c0_i32_1 = arith.constant 0 : i32
    return %c0_i32, %c0_i32_0 : i32, i32
  }
  func.func @transform_5(%arg0: i32) -> (i32, i32) {
    %c0_i32 = arith.constant 0 : i32
    %c0_i32_0 = arith.constant 0 : i32
    %c0_i32_1 = arith.constant 0 : i32
    return %c0_i32, %c0_i32_0 : i32, i32
  }
  func.func @transform_6(%arg0: i32) -> (i32, i32) {
    %c0_i32 = arith.constant 0 : i32
    %c0_i32_0 = arith.constant 0 : i32
    %c0_i32_1 = arith.constant 0 : i32
    return %c0_i32, %c0_i32_0 : i32, i32
  }
  func.func @transform_7(%arg0: i32) -> (i32, i32) {
    %c0_i32 = arith.constant 0 : i32
    %c0_i32_0 = arith.constant 0 : i32
    %c0_i32_1 = arith.constant 0 : i32
    return %c0_i32, %c0_i32_0 : i32, i32
  }
  func.func @transform_8(%arg0: i32) -> (i32, i32) {
    %c0_i32 = arith.constant 0 : i32
    %c0_i32_0 = arith.constant 0 : i32
    %c0_i32_1 = arith.constant 0 : i32
    return %c0_i32, %c0_i32_0 : i32, i32
  }
  func.func @transform_9(%arg0: i32) -> (i32, i32) {
    %c0_i32 = arith.constant 0 : i32
    %c0_i32_0 = arith.constant 0 : i32
    return %arg0, %c0_i32 : i32, i32
  }
}

</mosaic_0001>

<bundles_post_ra>
// kernel: adasparse_forward.1
= control target key start
LH: loop header
LB: loop body
LE: loop exit
PB: predicated region body
PF: predicated region fallthrough
CT: control target
= control target key end

     0   :  { %vm50_vm0 = vcmask 523264   ;;  %v103_v42 = vlaneseq  ;;  %vm174_vm7 = vcmask 130048   ;;  %vm267_vm13 = vcmask 261120   ;;  %s633_s2 = inlined_call_operand.vmem [shape: f32[64,64], index: 2, kind: input, shape index: {}]   ;;  %s634_s8 = inlined_call_operand.vmem [shape: f32[8,128], index: 8, kind: input, shape index: {}]   ;;  %s635_s1 = inlined_call_operand.vmem [shape: f32[8,64], index: 1, kind: input, shape index: {}]   ;;  %s636_s3 = inlined_call_operand.vmem [shape: f32[64,64], index: 3, kind: input, shape index: {}]   ;;  %s637_s4 = inlined_call_operand.vmem [shape: f32[80,64], index: 4, kind: input, shape index: {}]   ;;  %s638_s0 = inlined_call_operand.<no memory space> [shape: f32[1], index: 0, kind: input, shape index: {}]   ;;  %s639_s5 = inlined_call_operand.vmem [shape: f32[64,32], index: 5, kind: input, shape index: {}]   ;;  %s640_s6 = inlined_call_operand.vmem [shape: f32[48,32], index: 6, kind: input, shape index: {}]   ;;  %s641_s7 = inlined_call_operand.vmem [shape: f32[1,32], index: 7, kind: input, shape index: {}]   ;;  %s642_s9 = inlined_call_operand.vmem [shape: f32[8,1], index: 9, kind: output, shape index: {}]  }
   0x1   :  { %v48_v0 = vld [vmem:[%s633_s2 + $0x38] sm:$0xff]  ;;  %v47_v1 = vld [vmem:[%s633_s2 + $0x30] sm:$0xff]  ;;  %v46_v2 = vld [vmem:[%s633_s2 + $0x28] sm:$0xff]  ;;  %v540_v39 = vstv %s638_s0 }
   0x2   :  { %62 = vmatpush.msra.mxu0 %v48_v0  ;;  %v45_v3 = vld [vmem:[%s633_s2 + $0x20] sm:$0xff]  ;;  %v44_v4 = vld [vmem:[%s633_s2 + $0x18] sm:$0xff]  ;;  %v43_v5 = vld [vmem:[%s633_s2 + $0x10] sm:$0xff]  ;;  %v104_v45 = vand.u32 127, %v103_v42 }
   0x3   :  { %v42_v6 = vld [vmem:[%s633_s2 + $0x8] sm:$0xff]  ;;  %v41_v7 = vld [vmem:[%s633_s2] sm:$0xff]  ;;  %v115_v9 = vld [vmem:[%s636_s3 + $0x38] sm:$0xff] }
   0x4   :  { %63 = vmatpush.msra.mxu0 %v47_v1  ;;  %v491_v8 = vld [vmem:[%s635_s1] sm:$0xff]  ;;  %v114_v10 = vld [vmem:[%s636_s3 + $0x30] sm:$0xff]  ;;  %128 = vmatpush.msra.mxu1 %v115_v9  ;;  %v113_v11 = vld [vmem:[%s636_s3 + $0x28] sm:$0xff]  ;;  %vm105_vm5 = vcmp.lt.s32.totalorder %v104_v45, 16 }
   0x5   :  { %v391_v12 = vld [vmem:[%s634_s8] ss:$0 sm:$0xff]  ;;  %v111_v14 = vld [vmem:[%s636_s3 + $0x18] sm:$0xff]  ;;  %v110_v17 = vld [vmem:[%s636_s3 + $0x10] sm:$0xff] }
   0x6   :  { %64 = vmatpush.msra.mxu0 %v46_v2  ;;  %129 = vmatpush.msra.mxu1 %v114_v10  ;;  %v112_v13 = vld [vmem:[%s636_s3 + $0x20] sm:$0xff]  ;;  %v109_v19 = vld [vmem:[%s636_s3 + $0x8] sm:$0xff]  ;;  %v148_v26 = vld [vmem:[%s637_s4 + $0x38] sm:$0xff] }
   0x7   :  { %v108_v20 = vld [vmem:[%s636_s3] sm:$0xff]  ;;  %v150_v23 = vld [vmem:[%s637_s4 + $0x48] sm:$0xff]  ;;  %v147_v28 = vld [vmem:[%s637_s4 + $0x30] sm:$0xff] }
   0x8   :  { %65 = vmatpush.msra.mxu0 %v45_v3  ;;  %130 = vmatpush.msra.mxu1 %v113_v11  ;;  %v149_v24 = vld [vmem:[%s637_s4 + $0x40] sm:$0xff]  ;;  %v146_v31 = vld [vmem:[%s637_s4 + $0x28] sm:$0xff]  ;;  %v144_v52 = vld [vmem:[%s637_s4 + $0x18] sm:$0xff] }
   0x9   :  { %162 = vmatpush.msra.mxu2 %v150_v23  ;;  %v145_v51 = vld [vmem:[%s637_s4 + $0x20] sm:$0xff]  ;;  %v142_v53 = vld [vmem:[%s637_s4 + $0x8] sm:$0xff]  ;;  %v143_v54 = vld [vmem:[%s637_s4 + $0x10] sm:$0xff] }
   0xa   :  { %66 = vmatpush.msra.mxu0 %v44_v4  ;;  %131 = vmatpush.msra.mxu1 %v112_v13  ;;  %v141_v55 = vld [vmem:[%s637_s4] sm:$0xff]  ;;  %v235_v60 = vld [vmem:[%s639_s5 + $0x38] sm:$0xff]  ;;  %v234_v61 = vld [vmem:[%s639_s5 + $0x30] sm:$0xff] }
   0xb   :  { %163 = vmatpush.msra.mxu2 %v149_v24  ;;  %191 = vmatpush.msra.mxu3 %v142_v53  ;;  %v392_v56 = vld [vmem:[%s634_s8 + $0x1] ss:$0 sm:$0xff]  ;;  %v233_v62 = vld [vmem:[%s639_s5 + $0x28] sm:$0xff]  ;;  %v393_v0 = vld [vmem:[%s634_s8 + $0x2] ss:$0 sm:$0xff] }
   0xc   :  { %67 = vmatpush.msra.mxu0 %v43_v5  ;;  %132 = vmatpush.msra.mxu1 %v111_v14  ;;  %v232_v1 = vld [vmem:[%s639_s5 + $0x20] sm:$0xff]  ;;  %v231_v4 = vld [vmem:[%s639_s5 + $0x18] sm:$0xff]  ;;  %v229_v9 = vld [vmem:[%s639_s5 + $0x8] sm:$0xff] }
   0xd   :  { %164 = vmatpush.msra.mxu2 %v148_v26  ;;  %192 = vmatpush.msra.mxu3 %v141_v55  ;;  %v228_v10 = vld [vmem:[%s639_s5] sm:$0xff]  ;;  %v266_v13 = vld [vmem:[%s640_s6 + $0x28] sm:$0xff] }
   0xe   :  { %68 = vmatpush.msra.mxu0 %v42_v6  ;;  %133 = vmatpush.msra.mxu1 %v110_v17  ;;  %v230_v6 = vld [vmem:[%s639_s5 + $0x10] sm:$0xff]  ;;  %v262_v14 = vld [vmem:[%s640_s6 + $0x8] sm:$0xff] }
   0xf   :  { %165 = vmatpush.msra.mxu2 %v147_v28  ;;  %382 = vmatmul.msk.f32.vlgmr.msra.gmra.mxu3 %vm174_vm7, %v491_v8 }
  0x10   :  { %69 = vmatpush.msra.mxu0 %v41_v7  ;;  %134 = vmatpush.msra.mxu1 %v109_v19 }
  0x11   :  { %377 = vmatmul.msk.f32.vlgmr.msra.gmra.mxu0 %vm50_vm0, %v491_v8  ;;  %166 = vmatpush.msra.mxu2 %v146_v31 }
  0x12   :  { %135 = vmatpush.msra.mxu1 %v108_v20  ;;  %248 = vmatpush.msrb.mxu3 %v235_v60 }
  0x13   :  { %167 = vmatpush.msra.mxu2 %v145_v51  ;;  %283 = vmatpush.msrb.mxu0 %v266_v13 }
  0x14   :  { %249 = vmatpush.msrb.mxu3 %v234_v61  ;;  %305 = vmatpush.msrb.mxu1 %v262_v14 }
  0x15   :  { %168 = vmatpush.msra.mxu2 %v144_v52 }
  0x16   :  { %250 = vmatpush.msrb.mxu3 %v233_v62 }
  0x17   :  { %169 = vmatpush.msra.mxu2 %v143_v54 }
  0x18   :  { %251 = vmatpush.msrb.mxu3 %v232_v1 }
  0x1a   :  { %252 = vmatpush.msrb.mxu3 %v231_v4 }
  0x1c   :  { %253 = vmatpush.msrb.mxu3 %v230_v6 }
  0x1e   :  { %254 = vmatpush.msrb.mxu3 %v229_v9  ;;  %v397_v9 = vld [vmem:[%s634_s8 + $0x5] ss:$0 sm:$0xff] }
  0x20   :  { %255 = vmatpush.msrb.mxu3 %v228_v10 }
  0x8e   :  { %v71_v15 = vpop.f32.mrf.mxu0 }
  0x8f   :  { %v72_v16 = vadd.f32 %v391_v12, %v71_v15  ;;  %v265_v15 = vld [vmem:[%s640_s6 + $0x20] sm:$0xff] }
  0x90   :  { %284 = vmatpush.msrb.mxu0 %v265_v15 }
  0x91   :  { %v378_v18 = vmul.f32 -1.442695, %v72_v16 }
  0x92   :  { %v194_v63 = vpop.f32.mrf.mxu3 }
  0x93   :  { %398 = vpow2.f32 %v378_v18 }
  0x99   :  { %v399_v21 = vpop.eup %398 }
  0x9a   :  { %v77_v22 = vadd.f32 1.0, %v399_v21 }
  0x9c   :  { %400 = vrcp.f32 %v77_v22  ;;  %v89_v30 = vand.u32 2147483648, %v77_v22  ;;  %v87_v33 = vand.u32 2147483647, %v77_v22  ;;  %vm83_vm2 = vweird.f32 %v77_v22 }
  0x9e   :  { %v90_v35 = vor.u32 1.1754944e-38, %v89_v30  ;;  %vm88_vm4 = vcmp.eq.f32.partialorder %v87_v33, 8.507059e+37 }
  0xa2   :  { %v401_v25 = vpop.eup %400 }
  0xa3   :  { %v79_v27 = vmul.f32 %v401_v25, %v77_v22  ;;  %vm84_vm1 = vweird.f32 %v401_v25 }
  0xa4   :  { %vm85_vm3 = vmor %vm83_vm2, %vm84_vm1 }
  0xa5   :  { %v80_v29 = vsub.f32 1.0, %v79_v27 }
  0xa7   :  { %v81_v32 = vmul.f32 %v401_v25, %v80_v29 }
  0xa9   :  { %v82_v34 = vadd.f32 %v401_v25, %v81_v32 }
  0xab   :  { %v86_v36 = vsel %vm85_vm3, %v401_v25, %v82_v34 }
  0xac   :  { %v91_v37 = vsel %vm88_vm4, %v90_v35, %v86_v36  ;;  %v264_v35 = vld [vmem:[%s640_s6 + $0x18] sm:$0xff]  ;;  %v261_v36 = vld [vmem:[%s640_s6] sm:$0xff] }
  0xad   :  { %v93_v38 = vmul.f32 2.0, %v91_v37  ;;  %285 = vmatpush.msrb.mxu0 %v264_v35  ;;  %v263_v37 = vld [vmem:[%s640_s6 + $0x10] sm:$0xff]  ;;  %306 = vmatpush.msrb.mxu1 %v261_v36 }
  0xaf   :  { %v379_v40 = vadd.f32 -0.5, %v93_v38  ;;  %286 = vmatpush.msrb.mxu0 %v263_v37  ;;  %v394_v38 = vld [vmem:[%s634_s8 + $0x3] ss:$0 sm:$0xff] }
  0xb1   :  { %v96_v41 = vmul.f32 %v379_v40, %v540_v39 }
  0xb3   :  { %v97_v43 = vadd.f32 0.5, %v96_v41 }
  0xb5   :  { %v98_v44 = vmax.f32 %v97_v43, 0.0 }
  0xb7   :  { %v99_v46 = vmin.f32 %v98_v44, 2.0  ;;  %v395_v44 = vld [vmem:[%s634_s8 + $0x4] ss:$0 sm:$0xff] }
  0xb9   :  { %v100_v47 = vand.u32 2147483647, %v99_v46 }
  0xbb   :  { %vm101_vm6 = vcmp.ge.f32.partialorder %v100_v47, 0.01 }
  0xbc   :  { %v102_v48 = vsel %vm101_vm6, %v99_v46, 0.0  ;;  %vm371_vm6 = vcmask 7168  }
  0xbd   :  { %v106_v49 = vsel %vm105_vm5, 1.0, %v102_v48 }
  0xbe   :  { %v107_v50 = vmul.f32 %v106_v49, %v491_v8 }
  0xc0   :  { %380 = vmatmul.msk.f32.vlgmr.msra.gmra.mxu1 %vm50_vm0, %v107_v50 }
  0xc8   :  { %387 = vmatmul.msk.f32.vlgmr.msrb.gmra.mxu1 %vm174_vm7, %v491_v8 }
 0x13d   :  { %v137_v57 = vpop.f32.mrf.mxu1 }
 0x13e   :  { %v138_v58 = vadd.f32 %v392_v56, %v137_v57 }
 0x140   :  { %v140_v59 = vmax.f32 %v138_v58, 0.0 }
 0x142   :  { %381 = vmatmul.msk.f32.vlgmr.msra.gmra.mxu2 %vm50_vm0, %v140_v59 }
 0x145   :  { %v308_v43 = vpop.f32.mrf.mxu1 }
 0x1c5   :  { %v171_v2 = vpop.f32.mrf.mxu2 }
 0x1c6   :  { %v195_v3 = vadd.f32 %v194_v63, %v171_v2 }
 0x1c8   :  { %v198_v5 = vadd.f32 %v393_v0, %v195_v3  ;;  %v396_v3 = vld [vmem:[%s641_s7] ss:$0 sm:$0xff] }
 0x1ca   :  { %v383_v7 = vmul.f32 -1.442695, %v198_v5 }
 0x1cc   :  { %402 = vpow2.f32 %v383_v7 }
 0x1d2   :  { %v403_v11 = vpop.eup %402 }
 0x1d3   :  { %v202_v12 = vadd.f32 1.0, %v403_v11 }
 0x1d5   :  { %404 = vrcp.f32 %v202_v12  ;;  %v214_v19 = vand.u32 2147483648, %v202_v12  ;;  %v212_v21 = vand.u32 2147483647, %v202_v12  ;;  %vm208_vm9 = vweird.f32 %v202_v12 }
 0x1d7   :  { %v215_v23 = vor.u32 1.1754944e-38, %v214_v19  ;;  %vm213_vm11 = vcmp.eq.f32.partialorder %v212_v21, 8.507059e+37 }
 0x1db   :  { %v405_v16 = vpop.eup %404 }
 0x1dc   :  { %v204_v17 = vmul.f32 %v405_v16, %v202_v12  ;;  %vm209_vm8 = vweird.f32 %v405_v16 }
 0x1dd   :  { %vm210_vm10 = vmor %vm208_vm9, %vm209_vm8 }
 0x1de   :  { %v205_v18 = vsub.f32 1.0, %v204_v17 }
 0x1e0   :  { %v206_v20 = vmul.f32 %v405_v16, %v205_v18 }
 0x1e2   :  { %v207_v22 = vadd.f32 %v405_v16, %v206_v20 }
 0x1e4   :  { %v211_v24 = vsel %vm210_vm10, %v405_v16, %v207_v22 }
 0x1e5   :  { %v216_v25 = vsel %vm213_vm11, %v215_v23, %v211_v24 }
 0x1e6   :  { %v218_v26 = vmul.f32 2.0, %v216_v25 }
 0x1e8   :  { %v384_v27 = vadd.f32 -0.5, %v218_v26 }
 0x1ea   :  { %v220_v28 = vmul.f32 %v384_v27, %v540_v39 }
 0x1ec   :  { %v221_v29 = vadd.f32 0.5, %v220_v28 }
 0x1ee   :  { %v222_v30 = vmax.f32 %v221_v29, 0.0 }
 0x1f0   :  { %v223_v31 = vmin.f32 %v222_v30, 2.0 }
 0x1f2   :  { %v224_v32 = vand.u32 2147483647, %v223_v31 }
 0x1f4   :  { %vm225_vm12 = vcmp.ge.f32.partialorder %v224_v32, 0.01 }
 0x1f5   :  { %v226_v33 = vsel %vm225_vm12, %v223_v31, 0.0 }
 0x1f6   :  { %v227_v34 = vmul.f32 %v226_v33, %v140_v59 }
 0x1f8   :  { %385 = vmatmul.msk.f32.vlgmr.msrb.gmra.mxu3 %vm50_vm0, %v227_v34 }
 0x27b   :  { %v257_v40 = vpop.f32.mrf.mxu3 }
 0x27c   :  { %v258_v41 = vadd.f32 %v394_v38, %v257_v40 }
 0x27e   :  { %v260_v42 = vmax.f32 %v258_v41, 0.0 }
 0x280   :  { %386 = vmatmul.msk.f32.vlgmr.msrb.gmra.mxu0 %vm267_vm13, %v260_v42 }
 0x2fd   :  { %v288_v45 = vpop.f32.mrf.mxu0 }
 0x2fe   :  { %v309_v46 = vadd.f32 %v308_v43, %v288_v45 }
 0x300   :  { %v312_v47 = vadd.f32 %v395_v44, %v309_v46 }
 0x302   :  { %v388_v48 = vmul.f32 -1.442695, %v312_v47 }
 0x304   :  { %406 = vpow2.f32 %v388_v48 }
 0x30a   :  { %v407_v8 = vpop.eup %406 }
 0x30b   :  { %v316_v49 = vadd.f32 1.0, %v407_v8 }
 0x30d   :  { %408 = vrcp.f32 %v316_v49  ;;  %v328_v53 = vand.u32 2147483648, %v316_v49  ;;  %v326_v55 = vand.u32 2147483647, %v316_v49  ;;  %vm322_vm15 = vweird.f32 %v316_v49 }
 0x30f   :  { %v329_v57 = vor.u32 1.1754944e-38, %v328_v53  ;;  %vm327_vm1 = vcmp.eq.f32.partialorder %v326_v55, 8.507059e+37 }
 0x313   :  { %v409_v50 = vpop.eup %408 }
 0x314   :  { %v318_v51 = vmul.f32 %v409_v50, %v316_v49  ;;  %vm323_vm14 = vweird.f32 %v409_v50 }
 0x315   :  { %vm324_vm0 = vmor %vm322_vm15, %vm323_vm14 }
 0x316   :  { %v319_v52 = vsub.f32 1.0, %v318_v51 }
 0x318   :  { %v320_v54 = vmul.f32 %v409_v50, %v319_v52 }
 0x31a   :  { %v321_v56 = vadd.f32 %v409_v50, %v320_v54 }
 0x31c   :  { %v325_v58 = vsel %vm324_vm0, %v409_v50, %v321_v56 }
 0x31d   :  { %v330_v59 = vsel %vm327_vm1, %v329_v57, %v325_v58 }
 0x31e   :  { %v332_v60 = vmul.f32 2.0, %v330_v59 }
 0x320   :  { %v389_v61 = vadd.f32 -0.5, %v332_v60 }
 0x322   :  { %v334_v62 = vmul.f32 %v389_v61, %v540_v39 }
 0x324   :  { %v335_v63 = vadd.f32 0.5, %v334_v62 }
 0x326   :  { %v336_v0 = vmax.f32 %v335_v63, 0.0 }
 0x328   :  { %v337_v1 = vmin.f32 %v336_v0, 2.0 }
 0x32a   :  { %v338_v2 = vand.u32 2147483647, %v337_v1 }
 0x32c   :  { %vm339_vm2 = vcmp.ge.f32.partialorder %v338_v2, 0.01 }
 0x32d   :  { %v340_v4 = vsel %vm339_vm2, %v337_v1, 0.0 }
 0x32e   :  { %v341_v5 = vmul.f32 %v340_v4, %v260_v42 }
 0x330   :  { %v346_v6 = vmul.f32 %v396_v3, %v341_v5 }
 0x332   :  { %v347_v7 = vsel %vm267_vm13, %v346_v6, 0.0 }
 0x333   :  { %348 = vadd.xlane.f32.xlu0 %v347_v7 }
 0x3a6   :  { %v349_v39 = vpop.xlane.xlu0 %348 }
 0x3a7   :  { %v351_v10 = vadd.f32 %v397_v9, %v349_v39 }
 0x3a9   :  { %v390_v11 = vmul.f32 -1.442695, %v351_v10 }
 0x3ab   :  { %410 = vpow2.f32 %v390_v11 }
 0x3b1   :  { %v411_v12 = vpop.eup %410 }
 0x3b2   :  { %v355_v13 = vadd.f32 1.0, %v411_v12 }
 0x3b4   :  { %412 = vrcp.f32 %v355_v13  ;;  %v367_v17 = vand.u32 2147483648, %v355_v13  ;;  %v365_v19 = vand.u32 2147483647, %v355_v13  ;;  %vm361_vm4 = vweird.f32 %v355_v13 }
 0x3b6   :  { %v368_v21 = vor.u32 1.1754944e-38, %v367_v17  ;;  %vm366_vm7 = vcmp.eq.f32.partialorder %v365_v19, 8.507059e+37 }
 0x3ba   :  { %v413_v14 = vpop.eup %412 }
 0x3bb   :  { %v357_v15 = vmul.f32 %v413_v14, %v355_v13  ;;  %vm362_vm3 = vweird.f32 %v413_v14 }
 0x3bc   :  { %vm363_vm5 = vmor %vm361_vm4, %vm362_vm3 }
 0x3bd   :  { %v358_v16 = vsub.f32 1.0, %v357_v15 }
 0x3bf   :  { %v359_v18 = vmul.f32 %v413_v14, %v358_v16 }
 0x3c1   :  { %v360_v20 = vadd.f32 %v413_v14, %v359_v18 }
 0x3c3   :  { %v364_v22 = vsel %vm363_vm5, %v413_v14, %v360_v20 }
 0x3c4   :  { %v369_v23 = vsel %vm366_vm7, %v368_v21, %v364_v22 }
 0x3c5   :  { %372 = vst.msk [vmem:[%s642_s9] sm:$0xff] %vm371_vm6, %v369_v23 }

</bundles_post_ra>
